<compile_context>
chip_gen: v7x
topology: tpu7x:2x2x1
jax: 0.10.0
libtpu: 0.0.40
codegen_flags: <defaults>
</compile_context>

<pallas_src>
import functools

import jax
import jax.numpy as jnp
from jax.experimental import pallas as pl
from jax.experimental.pallas import tpu as pltpu

# Conservative budget for weights+biases resident in VMEM alongside the
# double-buffered activation/output tiles (v7x physical VMEM is 64 MiB,
# default scoped limit 32 MiB).
_VMEM_WEIGHT_BUDGET_BYTES = 24 * 1024 * 1024


def _make_fused_fcnet_kernel(num_layers):
    """Builds kernel(x_ref, w_0, b_0, ..., w_{L-1}, b_{L-1}, o_ref).

    Computes h_{l+1} = ReLU(h_l @ W_l + b_l) for every layer with the
    intermediate activations kept on-chip.  Weights are bf16 (single MXU
    pass), accumulation is f32, bias-add + ReLU are fused on the f32
    accumulator, and only the final activation is stored.
    """

    def kernel(x_ref, *refs):
        o_ref = refs[-1]
        h = x_ref[...]                                   # f32 (B, D0)
        for l in range(num_layers):                      # L=2 here; use fori_loop for deep nets
            w = refs[2 * l][...]                         # bf16 (Din, Dout)
            b = refs[2 * l + 1][...]                     # f32  (1,  Dout)
            y = jnp.dot(h.astype(jnp.bfloat16), w,
                        preferred_element_type=jnp.float32)
            h = jnp.maximum(y + b, 0.0)                  # fused epilogue on f32 acc
        o_ref[...] = h.astype(o_ref.dtype)

    return kernel


def make_fcnet_params(key, dims):
    """Deterministic init mimicking nn.Linear + weight_norm(dim=None).

    For each layer i: v ~ U(-1/sqrt(in), 1/sqrt(in)) of shape (out, in),
    g = ||v||_F (PyTorch's weight_norm init), bias ~ U(-1/sqrt(in), 1/sqrt(in)).
    """
    params = []
    for i in range(len(dims) - 1):
        in_dim, out_dim = dims[i], dims[i + 1]
        key, kv, kb = jax.random.split(key, 3)
        bound = 1.0 / jnp.sqrt(float(in_dim))
        v = jax.random.uniform(kv, (out_dim, in_dim), jnp.float32, -bound, bound)
        g = jnp.linalg.norm(v)            # scalar (dim=None weight norm)
        b = jax.random.uniform(kb, (out_dim,), jnp.float32, -bound, bound)
        params.append((v, g, b))
    return params


def prepare_fcnet_params(params):
    """One-time preprocessing: fold weight_norm (w_eff = g * v / ||v||_F),
    transpose to [Din, Dout] for x @ W, and cast weights to bf16 for a
    single-pass MXU matmul.  Biases stay f32 (added to the f32 accumulator).
    No padding: Mosaic masks non-(8,128)-aligned remainders at these sizes."""
    prepared = []
    total_bytes = 0
    for v, g, b in params:
        w_eff = (g / jnp.linalg.norm(v)) * v                 # (out, in), f32
        w_t = jnp.asarray(w_eff.T, jnp.bfloat16)             # (in, out), bf16
        b2 = jnp.asarray(b, jnp.float32).reshape(1, -1)      # (1, out),  f32
        total_bytes += w_t.size * 2 + b2.size * 4
        prepared.append((w_t, b2))
    # All weights stay VMEM-resident for the fused kernel; keep headroom
    # against the v7x 64 MiB physical / 32 MiB default scoped VMEM limit.
    assert total_bytes <= _VMEM_WEIGHT_BUDGET_BYTES, (
        f"FCNet weights ({total_bytes} B) exceed the fused-resident VMEM "
        f"budget; tile K/N or switch to a layered grid.")
    return prepared


@jax.jit
def fcnet_forward(x, prepared):
    """Fused FCNet forward: one gridless pallas_call, all layers on-chip.
    x is passed at its logical (B, D0) shape — no wrapper pad/slice ops."""
    flat = [a for wb in prepared for a in wb]
    num_layers = len(prepared)
    B = x.shape[0]
    out_dim = prepared[-1][0].shape[1]
    kernel = _make_fused_fcnet_kernel(num_layers)

    return pl.pallas_call(
        kernel,
        out_shape=jax.ShapeDtypeStruct((B, out_dim), jnp.float32),
        in_specs=[pl.BlockSpec(memory_space=pltpu.MemorySpace.VMEM)
                  for _ in range(1 + len(flat))],
        out_specs=pl.BlockSpec(memory_space=pltpu.MemorySpace.VMEM),
    )(x, *flat)


if __name__ == "__main__":
    key = jax.random.PRNGKey(0)
    dims = (32, 64, 48)          # FCNet(dims=[32, 64, 48], act='ReLU', dropout=0)
    batch = 8

    kx, kp = jax.random.split(key)
    x = jax.random.normal(kx, (batch, dims[0]), jnp.float32)
    params = make_fcnet_params(kp, dims)
    prepared = prepare_fcnet_params(params)   # one-time weight-norm fold + bf16 cast

    out = fcnet_forward(x, prepared)
    out = jax.block_until_ready(out)
    assert out.shape == (batch, dims[-1])

    # (1) Matched-precision reference: same bf16-input / f32-accumulate matmuls,
    #     outside Pallas — should agree very tightly with the kernel.
    ref_bf16 = x
    for w_bf16, b2 in prepared:
        y = jnp.dot(ref_bf16.astype(jnp.bfloat16), w_bf16,
                    preferred_element_type=jnp.float32)
        ref_bf16 = jnp.maximum(y + b2, 0.0)
    assert jnp.allclose(out, ref_bf16, atol=1e-3, rtol=1e-3)

    # (2) Full-f32 reference (PyTorch-module semantics): loose tolerance since
    #     the kernel deliberately runs bf16-input MXU passes.
    ref_f32 = x
    for v, g, b in params:
        w_eff = (g / jnp.linalg.norm(v)) * v
        ref_f32 = jnp.maximum(ref_f32 @ w_eff.T + b, 0.0)
    assert jnp.allclose(out, ref_f32, atol=5e-2, rtol=5e-2)

    print("KERNEL_OK")
</pallas_src>

<mosaic_0001>
module attributes {stable_mosaic.version = 11 : i64} {
  func.func @kernel(%arg0: memref<8x32xf32, #tpu.memory_space<vmem>>, %arg1: memref<32x64xbf16, #tpu.memory_space<vmem>>, %arg2: memref<1x64xf32, #tpu.memory_space<vmem>>, %arg3: memref<64x48xbf16, #tpu.memory_space<vmem>>, %arg4: memref<1x48xf32, #tpu.memory_space<vmem>>, %arg5: memref<8x48xf32, #tpu.memory_space<vmem>>) attributes {dimension_semantics = [], scalar_prefetch = 0 : i64, scratch_operands = 0 : i64, tpu.core_type = #tpu.core_type<tc>} {
    %c0 = arith.constant 0 : index
    %c0_0 = arith.constant 0 : index
    %0 = vector.load %arg0[%c0, %c0_0] : memref<8x32xf32, #tpu.memory_space<vmem>>, vector<8x32xf32>
    %c0_1 = arith.constant 0 : index
    %c0_2 = arith.constant 0 : index
    %1 = vector.load %arg1[%c0_1, %c0_2] : memref<32x64xbf16, #tpu.memory_space<vmem>>, vector<32x64xbf16>
    %c0_3 = arith.constant 0 : index
    %c0_4 = arith.constant 0 : index
    %2 = vector.load %arg2[%c0_3, %c0_4] : memref<1x64xf32, #tpu.memory_space<vmem>>, vector<1x64xf32>
    %3 = arith.truncf %0 : vector<8x32xf32> to vector<8x32xbf16>
    %cst = arith.constant dense<0.000000e+00> : vector<8x64xf32>
    %4 = tpu.matmul %3, %1, %cst {dimension_numbers = #tpu.dot_dimension_numbers<[1], [0], [0], [1], [0, 0, 1, 1], [], []>} : vector<8x32xbf16>, vector<32x64xbf16>, vector<8x64xf32> -> vector<8x64xf32>
    %5 = vector.broadcast %2 : vector<1x64xf32> to vector<8x64xf32>
    %6 = arith.addf %4, %5 : vector<8x64xf32>
    %cst_5 = arith.constant 0.000000e+00 : f32
    %7 = vector.broadcast %cst_5 : f32 to vector<8x64xf32>
    %8 = arith.maximumf %6, %7 : vector<8x64xf32>
    %c0_6 = arith.constant 0 : index
    %c0_7 = arith.constant 0 : index
    %9 = vector.load %arg3[%c0_6, %c0_7] : memref<64x48xbf16, #tpu.memory_space<vmem>>, vector<64x48xbf16>
    %c0_8 = arith.constant 0 : index
    %c0_9 = arith.constant 0 : index
    %10 = vector.load %arg4[%c0_8, %c0_9] : memref<1x48xf32, #tpu.memory_space<vmem>>, vector<1x48xf32>
    %11 = arith.truncf %8 : vector<8x64xf32> to vector<8x64xbf16>
    %cst_10 = arith.constant dense<0.000000e+00> : vector<8x48xf32>
    %12 = tpu.matmul %11, %9, %cst_10 {dimension_numbers = #tpu.dot_dimension_numbers<[1], [0], [0], [1], [0, 0, 1, 1], [], []>} : vector<8x64xbf16>, vector<64x48xbf16>, vector<8x48xf32> -> vector<8x48xf32>
    %13 = vector.broadcast %10 : vector<1x48xf32> to vector<8x48xf32>
    %14 = arith.addf %12, %13 : vector<8x48xf32>
    %cst_11 = arith.constant 0.000000e+00 : f32
    %15 = vector.broadcast %cst_11 : f32 to vector<8x48xf32>
    %16 = arith.maximumf %14, %15 : vector<8x48xf32>
    %c0_12 = arith.constant 0 : index
    %c0_13 = arith.constant 0 : index
    %17 = vector.load %arg5[%c0_12, %c0_13] : memref<8x48xf32, #tpu.memory_space<vmem>>, vector<8x48xf32>
    tpu.vector_store %arg5[%c0_12, %c0_13], %16 {strides = array<i32>} : memref<8x48xf32, #tpu.memory_space<vmem>>, vector<8x48xf32>,
    return
  }
}

</mosaic_0001>

<bundles_post_ra>
// kernel: fcnet_forward.1
= control target key start
LH: loop header
LB: loop body
LE: loop exit
PB: predicated region body
PF: predicated region fallthrough
CT: control target
= control target key end

     0   :  { %v264_v1 = vmov 0.0   ;;  %vm265_vm0 = vmmov 0   ;;  %vm47_vm1 = vcmask 261120   ;;  %s336_s0 = inlined_call_operand.vmem [shape: f32[8,32], index: 0, kind: input, shape index: {}]   ;;  %s337_s1 = inlined_call_operand.vmem [shape: bf16[32,64], index: 1, kind: input, shape index: {}]   ;;  %s338_s2 = inlined_call_operand.vmem [shape: f32[1,64], index: 2, kind: input, shape index: {}]   ;;  %s339_s3 = inlined_call_operand.vmem [shape: bf16[64,48], index: 3, kind: input, shape index: {}]   ;;  %s340_s4 = inlined_call_operand.vmem [shape: f32[1,48], index: 4, kind: input, shape index: {}]   ;;  %s341_s5 = inlined_call_operand.hbm [shape: f32[8,48], index: 5, kind: output, shape index: {}]  }
   0x1   :  { %v234_v0 = vld [vmem:[%s337_s1] sm:$0xff]   ;;  %211 = vmatprep.subr.bf16.mxu0 %v264_v1  ;;  %v235_v2 = vld [vmem:[%s337_s1 + $0x8] sm:$0xff]   ;;  %219 = vmatprep.subr.bf16.mxu1 %v264_v1 }
   0x2   :  { %212 = vmatpush3.bf16.msra.mxu0 %v234_v0  ;;  %215 = vmatprep.mubr.msk.bf16.mxu0 %vm265_vm0, %v264_v1  ;;  %v22_v3 = vld [vmem:[%s336_s0] sm:$0xff]  ;;  %v237_v5 = vld [vmem:[%s339_s3 + $0x8] sm:$0xff]  }
   0x3   :  { %213 = vmatprep.subr.bf16.mxu0 %v264_v1  ;;  %v236_v4 = vld [vmem:[%s339_s3] sm:$0xff]   ;;  %227 = vmatprep.mubr.msk.bf16.mxu1 %vm265_vm0, %v264_v1  ;;  %v28_v6 = vpack.c.bf16 %v22_v3, %v22_v3 }
   0x4   :  { %220 = vmatpush3.bf16.msra.mxu1 %v236_v4 }
   0x5   :  { %221 = vmatprep.subr.bf16.mxu1 %v264_v1 }
   0x6   :  { %214 = vmatpush3.bf16.msra.mxu0 %v235_v2 }
   0x7   :  { %10 = vsyncpa [#allocation3], 0  ;;  %v238_v7 = vld [vmem:[%s339_s3 + $0x10] sm:$0xff]   ;;  %v239_v8 = vld [vmem:[%s339_s3 + $0x18] sm:$0xff]   ;;  %vm132_vm2 = vcmask 523264   ;;  %s266_s3 = smov [#allocation2]  }
   0x8   :  { %222 = vmatpush3.bf16.msra.mxu1 %v237_v5  ;;  %v193_v9 = vld [vmem:[%s338_s2] ss:$0 sm:$0xff]  ;;  %s185_s9 = sshll.u32 %s266_s3, 4  ;;  %vm177_vm3 = vcmask 392192   ;;  %s186_s9 = int_to_ptr.vmem [resolvable:$true] %s185_s9 }
   0x9   :  { %216 = vmatmul.mubr.msk.bf16.vlgmr.msra.gmra.mrb[0].mxu0 %vm47_vm1, %v28_v6  ;;  %223 = vmatprep.subr.bf16.mxu1 %v264_v1  ;;  %v197_v17 = vld [vmem:[%s340_s4] ss:$0 sm:$0xff]  ;;  %s240_s2 = scalar_lea.vmem %s186_s9, 128  ;;  %p245_p1 = scmp.lt.s32.totalorder %s186_s9, %s186_s9 }
   0xa   :  { %p241_p0 = scmp.ne.s32.totalorder %s186_s9, %s240_s2  ;;  %p246_p2 = scmp.lt.s32.totalorder %s240_s2, %s240_s2 }
   0xc   :  { %224 = vmatpush3.bf16.msra.mxu1 %v238_v7  ;;  %p247_p3 = por %p246_p2, %p245_p1 }
   0xd   :  { %225 = vmatprep.subr.bf16.mxu1 %v264_v1 }
   0xe   :  { %p248_p4 = pnand %p247_p3, %p241_p0 }
  0x10   :  { %226 = vmatpush3.bf16.msra.mxu1 %v239_v8 }
  0xdc   :  { %v85_v10 = vpop.f32.mrb[0].mxu0 }
  0xdd   :  { %v86_v11 = vadd.f32 %v193_v9, %v85_v10  ;;  %v217_v12 = vpop.f32.mrb[1].mxu0 }
  0xde   :  { %v88_v13 = vpop.f32.mrb[2].mxu0 }
  0xdf   :  { %v91_v14 = vmax.f32 %v86_v11, 0.0  ;;  %v218_v15 = vpop.f32.mrb[3].mxu0 }
  0xe1   :  { %v101_v16 = vpack.c.bf16 %v91_v14, %v91_v14 }
  0xe3   :  { %228 = vmatmul.mubr.msk.bf16.vlgmr.msra.gmra.mrb[0].mxu1 %vm132_vm2, %v101_v16 }
 0x1b6   :  { %v170_v18 = vpop.f32.mrb[0].mxu1 }
 0x1b7   :  { %v171_v19 = vadd.f32 %v197_v17, %v170_v18  ;;  %v229_v20 = vpop.f32.mrb[1].mxu1 }
 0x1b8   :  { %v173_v21 = vpop.f32.mrb[2].mxu1 }
 0x1b9   :  { %v176_v22 = vmax.f32 %v171_v19, 0.0  ;;  %v230_v23 = vpop.f32.mrb[3].mxu1 }
 0x1bb   :  { %178 = vst.msk [vmem:[#allocation2] sm:$0xff] %vm177_vm3, %v176_v22 }
 0x1bc   :  { %251 = shalt.err (!%p248_p4)
}
 0x1bd   :  { %s252_s11 = scalar_lea.hbm %s341_s5, 128 }
 0x1be   :  { %p253_p5 = scmp.ne.s32.totalorder %s341_s5, %s252_s11  ;;  %p256_p6 = scmp.lt.u32.totalorder %s252_s11, %s341_s5 }
 0x1c0   :  { %p258_p7 = pnand %p256_p6, %p253_p5 }
 0x1c2   :  { %261 = shalt.err (!%p258_p7)
}
 0x1c3   :  { %188 = dma.vmem_to_hbm [thread:$0]  %s186_s9, 128, %s341_s5, [#allocation3]  }
 0x1c4   :  { %262 = dma.done.wait [#allocation3], 128  }
 0x1c5   :  { %263 = vsyncadd [#allocation3], 4294967168 }
 0x1c6   :  { %192 = vsyncpa [#allocation3], 1 }

</bundles_post_ra>
